<compile_context>
chip_gen: v7x
topology: tpu7x:2x2x1
jax: 0.10.0
libtpu: 0.0.40
codegen_flags: <defaults>
</compile_context>

<pallas_src>
import functools

import jax
import jax.numpy as jnp
from jax.experimental import pallas as pl
from jax.experimental.pallas import tpu as pltpu


def _patch_embed_matmul_kernel(p_ref, w_ref, b_ref, o_ref):
    # p_ref: (TM, K) bf16 patch tile   (streamed over the M grid axis)
    # w_ref: (K, E)  bf16 projection   (resident: constant index_map)
    # b_ref: (1, E)  f32  bias         (resident)
    # o_ref: (TM, E) output tile in the requested output dtype
    acc = jnp.dot(p_ref[...], w_ref[...], preferred_element_type=jnp.float32)
    o_ref[...] = (acc + b_ref[...]).astype(o_ref.dtype)


def _pick_tiling():
    """Per-generation (tile_m, vmem_limit_bytes) choice.

    128 MiB-VMEM parts (v5e/v6e): tile_m=32768 (~48 MiB live incl. lane
    padding + double buffering), scoped limit 64 MiB.
    64 MiB-VMEM parts (v7x) or unknown: tile_m=16384 (~24 MiB live), 40 MiB.
    """
    tile_m, vmem_limit = 16384, 40 << 20
    try:
        info = pltpu.get_tpu_info()
        vmem_cap = getattr(info, "vmem_capacity_bytes", None)
        if vmem_cap is not None and int(vmem_cap) >= (100 << 20):
            tile_m, vmem_limit = 32768, 64 << 20
    except Exception:
        pass  # conservative default is safe on every generation
    return tile_m, vmem_limit


def patch_embed_forward(x, weight, bias, patch_size, *,
                        compute_dtype=jnp.bfloat16, out_dtype=None,
                        tile_m=None):
    """
    x:      (B, C, H, W)  NCHW, PyTorch layout
    weight: (E, C, p, p)  conv weight (PyTorch OIHW layout)
    bias:   (E,)
    Returns (tokens, Hp, Wp) with tokens of shape (B, Hp*Wp, E) in `out_dtype`
    (default: x.dtype), matching PyTorch's
    `self.proj(x).flatten(2).transpose(1, 2)` with norm_layer=None (Identity).
    """
    p = int(patch_size)
    B, C, H, W = x.shape
    E = weight.shape[0]
    if out_dtype is None:
        out_dtype = x.dtype

    # F.pad semantics: pad right/bottom so H, W become multiples of p.
    # Cast to the compute dtype BEFORE padding so the pad touches half the
    # bytes; under jit the cast/pad/reshape/transpose below fuse into one
    # XLA pass (read x f32 once, write bf16 patches once).
    pad_h = (-H) % p
    pad_w = (-W) % p
    xc = x.astype(compute_dtype)
    if pad_h or pad_w:
        xc = jnp.pad(xc, ((0, 0), (0, 0), (0, pad_h), (0, pad_w)))
    H_pad, W_pad = H + pad_h, W + pad_w
    Hp, Wp = H_pad // p, W_pad // p

    # im2col: (B, C, Hp, p, Wp, p) -> (B, Hp, Wp, C, p, p) -> (M, K)
    patches = xc.reshape(B, C, Hp, p, Wp, p)
    patches = patches.transpose(0, 2, 4, 1, 3, 5)
    patches = patches.reshape(B * Hp * Wp, C * p * p)

    # Conv weight (E, C, p, p) -> dense projection (K, E); bias -> (1, E) f32.
    w_mat = weight.reshape(E, C * p * p).T.astype(compute_dtype)
    b_mat = bias.reshape(1, E).astype(jnp.float32)

    M, K = patches.shape

    auto_tile, vmem_limit = _pick_tiling()
    if tile_m is None:
        tile_m = auto_tile
    tile_m = max(8, (int(tile_m) // 8) * 8)   # sublane-aligned

    if M <= tile_m:
        # Split into (at most) 2 blocks so v7x can shard the "parallel" M axis
        # across both TensorCores even for a single small image; no-op on
        # single-TC parts.  Block shape equal to full M (when M <= 8) is legal.
        tm = min(M, max(8, ((pl.cdiv(M, 2) + 7) // 8) * 8))
    else:
        tm = tile_m
    grid = (pl.cdiv(M, tm),)

    out = pl.pallas_call(
        _patch_embed_matmul_kernel,
        out_shape=jax.ShapeDtypeStruct((M, E), out_dtype),
        grid_spec=pltpu.PrefetchScalarGridSpec(
            num_scalar_prefetch=0,
            grid=grid,
            in_specs=[
                pl.BlockSpec((tm, K), lambda i: (i, 0)),   # streamed over M
                pl.BlockSpec((K, E), lambda i: (0, 0)),    # resident weight
                pl.BlockSpec((1, E), lambda i: (0, 0)),    # resident bias
            ],
            out_specs=pl.BlockSpec((tm, E), lambda i: (i, 0)),
        ),
        compiler_params=pltpu.CompilerParams(
            # Independent M tiles: lets v7x shard the grid across its 2 TCs.
            dimension_semantics=("parallel",),
            # Explicit scoped limit (v5e default is only 16 MiB); stays well
            # under v7x's 64 MiB physical VMEM.
            vmem_limit_bytes=vmem_limit,
        ),
    )(patches, w_mat, b_mat)

    tokens = out.reshape(B, Hp * Wp, E)
    return tokens, Hp, Wp


def _reference(x, weight, bias, patch_size):
    """Pure-JAX reference matching the PyTorch forward (pad -> conv -> flatten)."""
    p = patch_size
    _, _, H, W = x.shape
    pad_h = (-H) % p
    pad_w = (-W) % p
    if pad_h or pad_w:
        x = jnp.pad(x, ((0, 0), (0, 0), (0, pad_h), (0, pad_w)))
    y = jax.lax.conv_general_dilated(
        x, weight, window_strides=(p, p), padding="VALID",
        dimension_numbers=("NCHW", "OIHW", "NCHW"),
        precision=jax.lax.Precision.HIGHEST,
    ) + bias.reshape(1, -1, 1, 1)
    B, E, Hp, Wp = y.shape
    return y.reshape(B, E, Hp * Wp).transpose(0, 2, 1), Hp, Wp


@functools.partial(jax.jit, static_argnames=("patch_size", "out_dtype", "tile_m"))
def _run(x, weight, bias, *, patch_size, out_dtype=None, tile_m=None):
    return patch_embed_forward(x, weight, bias, patch_size,
                               out_dtype=out_dtype, tile_m=tile_m)


if __name__ == "__main__":
    patch_size = 4
    in_c = 3
    embed_dim = 96

    key = jax.random.PRNGKey(0)
    kw, kb, k1, k2, k3 = jax.random.split(key, 5)

    fan_in = in_c * patch_size * patch_size
    weight = jax.random.normal(kw, (embed_dim, in_c, patch_size, patch_size),
                               dtype=jnp.float32) * (1.0 / fan_in) ** 0.5
    bias = jax.random.normal(kb, (embed_dim,), dtype=jnp.float32) * 0.01

    # bf16-rounded copy so the f32 reference sees the same input quantization
    # the bf16-compute kernel sees (the kernel still accumulates in f32).
    wq = weight.astype(jnp.bfloat16).astype(jnp.float32)

    # (B, H, W, tile_m): 2-step grid, padded-input case, and a many-step grid
    # with a partial (masked) last block.
    cases = [
        (2, 16, 16, None),
        (2, 18, 18, None),
        (2, 32, 32, 48),
    ]
    for (B, H, W, tile_m), k in zip(cases, (k1, k2, k3)):
        x = jax.random.normal(k, (B, in_c, H, W), dtype=jnp.float32)
        tokens, Hp, Wp = _run(x, weight, bias, patch_size=patch_size,
                              tile_m=tile_m)
        tokens = jax.block_until_ready(tokens)
        Hp, Wp = int(Hp), int(Wp)

        xq = x.astype(jnp.bfloat16).astype(jnp.float32)
        ref_tokens, rHp, rWp = _reference(xq, wq, bias, patch_size)

        assert (Hp, Wp) == (rHp, rWp), ((Hp, Wp), (rHp, rWp))
        assert tokens.shape == (B, Hp * Wp, embed_dim), tokens.shape
        assert tokens.dtype == x.dtype, tokens.dtype
        max_err = float(jnp.max(jnp.abs(tokens - ref_tokens)))
        assert jnp.allclose(tokens, ref_tokens, atol=2e-3, rtol=2e-3), max_err

    # bf16-token output path (halves the dominant output-write HBM traffic).
    x = jax.random.normal(k3, (2, in_c, 32, 32), dtype=jnp.float32)
    tok_bf16, Hp, Wp = _run(x, weight, bias, patch_size=patch_size,
                            out_dtype=jnp.bfloat16)
    tok_bf16 = jax.block_until_ready(tok_bf16)
    assert tok_bf16.dtype == jnp.bfloat16
    xq = x.astype(jnp.bfloat16).astype(jnp.float32)
    ref_tokens, _, _ = _reference(xq, wq, bias, patch_size)
    assert jnp.allclose(tok_bf16.astype(jnp.float32), ref_tokens,
                        atol=2e-2, rtol=2e-2)

    print("KERNEL_OK")
</pallas_src>

<mosaic_0001>
module attributes {stable_mosaic.version = 11 : i64} {
  func.func @_patch_embed_matmul_kernel(%arg0: i32, %arg1: memref<16x48xbf16, #tpu.memory_space<vmem>>, %arg2: memref<48x96xbf16, #tpu.memory_space<vmem>>, %arg3: memref<1x96xf32, #tpu.memory_space<vmem>>, %arg4: memref<16x96xf32, #tpu.memory_space<vmem>>) attributes {dimension_semantics = [#tpu.dimension_semantics<parallel>], iteration_bounds = array<i64: 2>, scalar_prefetch = 0 : i64, scratch_operands = 0 : i64, tpu.core_type = #tpu.core_type<tc>, window_params = [{transform_indices = @transform_0, window_bounds = array<i64: 16, 48>}, {pipeline_mode = #tpu.pipeline_mode<synchronous>, transform_indices = @transform_1, window_bounds = array<i64: 48, 96>}, {pipeline_mode = #tpu.pipeline_mode<synchronous>, transform_indices = @transform_2, window_bounds = array<i64: 1, 96>}, {transform_indices = @transform_3, window_bounds = array<i64: 16, 96>}]} {
    %c0 = arith.constant 0 : index
    %c0_0 = arith.constant 0 : index
    %0 = vector.load %arg1[%c0, %c0_0] : memref<16x48xbf16, #tpu.memory_space<vmem>>, vector<16x48xbf16>
    %c0_1 = arith.constant 0 : index
    %c0_2 = arith.constant 0 : index
    %1 = vector.load %arg2[%c0_1, %c0_2] : memref<48x96xbf16, #tpu.memory_space<vmem>>, vector<48x96xbf16>
    %cst = arith.constant dense<0.000000e+00> : vector<16x96xf32>
    %2 = tpu.matmul %0, %1, %cst {dimension_numbers = #tpu.dot_dimension_numbers<[1], [0], [0], [1], [0, 0, 1, 1], [], []>} : vector<16x48xbf16>, vector<48x96xbf16>, vector<16x96xf32> -> vector<16x96xf32>
    %c0_3 = arith.constant 0 : index
    %c0_4 = arith.constant 0 : index
    %3 = vector.load %arg3[%c0_3, %c0_4] : memref<1x96xf32, #tpu.memory_space<vmem>>, vector<1x96xf32>
    %4 = vector.broadcast %3 : vector<1x96xf32> to vector<16x96xf32>
    %5 = arith.addf %2, %4 : vector<16x96xf32>
    %c0_5 = arith.constant 0 : index
    %c0_6 = arith.constant 0 : index
    %6 = vector.load %arg4[%c0_5, %c0_6] : memref<16x96xf32, #tpu.memory_space<vmem>>, vector<16x96xf32>
    tpu.vector_store %arg4[%c0_5, %c0_6], %5 {strides = array<i32>} : memref<16x96xf32, #tpu.memory_space<vmem>>, vector<16x96xf32>,
    return
  }
  func.func @transform_0(%arg0: i32) -> (i32, i32) {
    %c0_i32 = arith.constant 0 : i32
    %c0_i32_0 = arith.constant 0 : i32
    return %arg0, %c0_i32 : i32, i32
  }
  func.func @transform_1(%arg0: i32) -> (i32, i32) {
    %c0_i32 = arith.constant 0 : i32
    %c0_i32_0 = arith.constant 0 : i32
    %c0_i32_1 = arith.constant 0 : i32
    return %c0_i32, %c0_i32_0 : i32, i32
  }
  func.func @transform_2(%arg0: i32) -> (i32, i32) {
    %c0_i32 = arith.constant 0 : i32
    %c0_i32_0 = arith.constant 0 : i32
    %c0_i32_1 = arith.constant 0 : i32
    return %c0_i32, %c0_i32_0 : i32, i32
  }
  func.func @transform_3(%arg0: i32) -> (i32, i32) {
    %c0_i32 = arith.constant 0 : i32
    %c0_i32_0 = arith.constant 0 : i32
    return %arg0, %c0_i32 : i32, i32
  }
}

</mosaic_0001>

<bundles_post_ra>
// kernel: _run.1
= control target key start
LH: loop header
LB: loop body
LE: loop exit
PB: predicated region body
PF: predicated region fallthrough
CT: control target
= control target key end

     0   :  { %8 = vsyncpa [#allocation3], 0  ;;  %s618_s0 = inlined_call_operand.vmem [shape: bf16[32,48], index: 0, kind: input, shape index: {}]   ;;  %s619_s1 = inlined_call_operand.vmem [shape: bf16[48,96], index: 1, kind: input, shape index: {}]   ;;  %s620_s2 = inlined_call_operand.vmem [shape: f32[1,96], index: 2, kind: input, shape index: {}]   ;;  %s621_s3 = inlined_call_operand.hbm [shape: f32[32,96], index: 3, kind: output, shape index: {}]  }
   0x1   :  { %10 = vsyncpa [#allocation3 + $0x1], 0  ;;  %s504_s12 = smov 0   ;;  %s506_s13 = smov 0  }
   0x2   :  { %s508_s14 = smov 0   ;;  %s510_s15 = smov 0  }
   0x3 LB: > { %s525_s16 = sadd.s32 4294967295, %s477_s15   ;;  %s335_s17 = sadd.s32 4294967294, %s477_s15   ;;  %s477_s15 = sphi %s510_s15, %s627_s15   ;;  %s473_s14 = sphi %s508_s14, %s626_s14   ;;  %s469_s13 = sphi %s506_s13, %s625_s13   ;;  %s465_s12 = sphi %s504_s12, %s624_s12  }
   0x4   : > { %s529_s18 = sadd.s32 1, %s477_s15   ;;  %s91_s19 = sadd.s32 1, %s473_s14 }
   0x5   : > { %s88_s20 = ssub.s32 %s477_s15, %s529_s18  ;;  %p101_p0 = scmp.ne.s32.totalorder %s473_s14, %s469_s13 }
   0x6   : > { %p89_p1 = scmp.eq.s32.totalorder %s88_s20, 0  ;;  %p102_p2 = scmp.eq.s32.totalorder %s525_s16, 1 }
   0x7   : > { %p107_p3 = scmp.ne.s32.totalorder %s469_s13, %s465_s12  ;;  %p108_p4 = scmp.eq.s32.totalorder %s335_s17, 1 }
   0x8   : > { %s540_s21 = scalar_select %p89_p1, %s473_s14, %s91_s19  }
   0x9   : > { %p542_p5 = por %p102_p2, %p101_p0  ;;  %p546_p6 = por %p108_p4, %p107_p3 }
   0xa   : > { %p338_p7 = scmp.ge.s32.totalorder %s477_s15, 1  ;;  %p141_p8 = scmp.lt.s32.totalorder %s477_s15, 3 }
   0xc   : > { %p142_p9 = pnand %p338_p7, %p141_p8 }
   0xd   : > { %v411_v0 = vld [vmem:[%s619_s1] sm:$0xff] (!%p142_p9)   ;;  %v479_v1 = vmov (!%p142_p9), 0.0   ;;  %v412_v2 = vld [vmem:[%s619_s1 + $0x8] sm:$0xff] (!%p142_p9)   ;;  %vm480_vm0 = vmmov (!%p142_p9), 0   ;;  %s340_s28 = sshll.u32 (!%p142_p9), %s525_s16, 1  ;;  %v413_v3 = vld [vmem:[%s619_s1 + $0x10] sm:$0xff] (!%p142_p9)  }
   0xe   : > { %145 = sbr.rel (%p142_p9) target bundleno = 257 (0x101), region = 32  ;;  %358 = vmatprep.subr.bf16.mxu0 (!%p142_p9), %v479_v1  ;;  %364 = vmatprep.mubr.msk.bf16.mxu0 (!%p142_p9), %vm480_vm0, %v479_v1  ;;  %p166_p10 = scmp.lt.s32.totalorder (!%p142_p9), %s340_s28, 3  ;;  %vm211_vm1 = vcmask (!%p142_p9), 392192   ;;  %v342_v5 = vld [vmem:[%s620_s2] ss:$0 sm:$0xff] (!%p142_p9)  ;;  %vm256_vm2 = vcmask (!%p142_p9), 785408  }
   0xf   : > { %359 = vmatpush3.bf16.msra.mxu0 (!%p142_p9), %v411_v0  ;;  %s162_s8 = sand.u32 (!%p142_p9), 1, %s469_s13   ;;  %s353_s20 = sshll.u32 (!%p142_p9), %s525_s16, 8 }
  0x10   : > { %360 = vmatprep.subr.bf16.mxu0 (!%p142_p9), %v479_v1  ;;  %s339_s9 = sshll.u32 (!%p142_p9), %s162_s8, 4  ;;  %s575_s26 = scalar_lea.hbm (!%p142_p9), %s621_s3, %s353_s20 }
  0x11   : > { %s164_s17 = scalar_lea.vmem (!%p142_p9), [#allocation2], %s339_s9  ;;  %s577_s16 = scalar_lea.sflag (!%p142_p9), [#allocation3], %s162_s8 }
  0x12   : > { %s273_s19 = sshll.u32 (!%p142_p9), %s164_s17, 4  ;;  %s570_s19 = int_to_ptr.vmem [resolvable:$true] %s273_s19 }
  0x13   : > { %361 = vmatpush3.bf16.msra.mxu0 (!%p142_p9), %v412_v2  ;;  %s415_s27 = scalar_lea.vmem (!%p142_p9), %s570_s19, 256 }
  0x14   : > { %362 = vmatprep.subr.bf16.mxu0 (!%p142_p9), %v479_v1  ;;  %p416_p11 = scmp.ne.s32.totalorder (!%p142_p9), %s570_s19, %s415_s27 }
  0x15   : > { %s629_s28 = smov (!%p166_p10, %s340_s28), 3 }
  0x16   : > { %s341_s4 = sshll.u32 %s629_s28, 2  ;;  %p417_p12 = pnand %p416_p11, %p542_p5 }
  0x17   : > { %s169_s7 = scalar_lea.vmem %s618_s0, %s341_s4  ;;  %363 = vmatpush3.bf16.msra.mxu0 %v413_v3  ;;  %s481_s28 = smov [#allocation2]  }
  0x18   : > { %v414_v4 = vld [vmem:[%s169_s7] sm:$0xff]   ;;  %p418_p13 = pneg %p417_p12  ;;  %s419_s29 = sshll.u32 %s481_s28, 4  ;;  %s420_s29 = int_to_ptr.vmem [resolvable:$false] %s419_s29 }
  0x19   : > { %s421_s30 = scalar_lea.vmem %s420_s29, 512  ;;  %p422_p0 = scmp.lt.s32.totalorder %s570_s19, %s420_s29 }
  0x1a   : > { %365 = vmatmul.mubr.msk.bf16.vlgmr.msra.gmra.mrb[0].mxu0 %vm211_vm1, %v414_v4  ;;  %p423_p1 = scmp.lt.s32.totalorder %s421_s30, %s415_s27 }
  0x1c   : > { %p424_p2 = por %p423_p1, %p422_p0 }
  0x1e   : > { %p425_p3 = pnand %p424_p2, %p418_p13 }
  0xed   : > { %v249_v6 = vpop.f32.mrb[0].mxu0 }
  0xee   : > { %v250_v7 = vadd.f32 %v342_v5, %v249_v6  ;;  %v366_v8 = vpop.f32.mrb[1].mxu0 }
  0xef   : > { %v252_v9 = vpop.f32.mrb[2].mxu0 }
  0xf0   : > { %257 = vst.msk [vmem:[%s164_s17] sm:$0xff] %vm256_vm2, %v250_v7  ;;  %v253_v10 = vadd.f32 %v342_v5, %v252_v9  ;;  %v367_v11 = vpop.f32.mrb[3].mxu0 }
  0xf2   : > { %258 = vst.msk [vmem:[%s164_s17 + $0x8] sm:$0xff] %vm256_vm2, %v253_v10 }
  0xf3   : > { %428 = shalt.err (!%p425_p3)
}
  0xf4   : > { %s429_s4 = scalar_lea.hbm %s575_s26, 256  ;;  %s433_s7 = scalar_lea.hbm %s621_s3, 512 }
  0xf5   : > { %p430_p4 = scmp.ne.s32.totalorder %s575_s26, %s429_s4  ;;  %p434_p9 = scmp.lt.u32.totalorder %s575_s26, %s621_s3 }
  0xf6   : > { %p435_p10 = scmp.lt.u32.totalorder %s433_s7, %s429_s4  ;;  %p437_p12 = scmp.lt.u32.totalorder %s429_s4, %s575_s26 }
  0xf7   : > { %p431_p7 = pnand %p430_p4, %p542_p5 }
  0xf8   : > { %p436_p11 = por %p435_p10, %p434_p9 }
  0xf9   : > { %p432_p8 = pneg %p431_p7 }
  0xfa   : > { %p438_p13 = por %p437_p12, %p436_p11 }
  0xfc   : > { %p439_p0 = pnand %p438_p13, %p432_p8 }
  0xfe   : > { %442 = shalt.err (!%p439_p0)
}
  0xff   : > { %s482_s10 = smov 128   ;;  %s483_s11 = smov 8  }
 0x100   : > { %368 = dma.vmem_to_hbm [thread:$0]  (%p542_p5), %s570_s19, 256, %s575_s26, %s577_s16, %s482_s10, %s482_s10, %s483_s11  }
 0x101 PF: > { %p374_p1 = scmp.ge.s32.totalorder %s477_s15, 2  ;;  %s288_s17 = sand.u32 1, %s465_s12  }
 0x102   : > { %s289_s20 = scalar_lea.sflag [#allocation3], %s288_s17 }
 0x103   : > { %p371_p2 = pnand %p374_p1, %p546_p6 }
 0x105   : > { %460 = dma.done.wait (!%p371_p2), %s289_s20, 256  }
 0x106   : > { %462 = vsyncadd (!%p371_p2), %s289_s20, 4294967040  ;;  %p13_p3 = scmp.ge.s32.totalorder %s529_s18, 4   ;;  %s624_s12 = smov %s469_s13 }
 0x107   : > { %s625_s13 = smov %s473_s14  ;;  %s626_s14 = smov %s540_s21 }
 0x108   : > { %s627_s15 = smov %s529_s18  ;;  %15 = sbr.rel (!%p13_p3) target bundleno = 3 (0x3), region = 67 }
 0x10f   :  { %294 = vsyncpa [#allocation3], 1 }
 0x110   :  { %296 = vsyncpa [#allocation3 + $0x1], 1 }

</bundles_post_ra>
